<compile_context>
chip_gen: v6e
topology: v6e:2x2x1
jax: 0.10.0
libtpu: 0.0.40
codegen_flags: <defaults>
</compile_context>

<pallas_src>
import functools

import jax
import jax.numpy as jnp
from jax import lax
from jax.experimental import pallas as pl
from jax.experimental.pallas import tpu as pltpu


def _dice_kernel(score_ref, tgt_ref, i_out, y_out, z_out, *,
                 hw, s_tile, tiles_per_chunk, apply_softmax, needs_mask):
    c = pl.program_id(1)          # HW chunk index ("parallel")
    t = pl.program_id(2)          # tile index within chunk ("arbitrary")

    @pl.when(t == 0)
    def _init():
        i_out[...] = jnp.zeros_like(i_out)
        y_out[...] = jnp.zeros_like(y_out)
        z_out[...] = jnp.zeros_like(z_out)

    tile_px = s_tile * 128
    base = (c * tiles_per_chunk + t) * tile_px     # first nominal pixel of tile

    def _accumulate(mask_tail):
        score = score_ref[...].astype(jnp.float32)            # [C, S_tile, 128]
        n_cls = score.shape[0]

        if apply_softmax:
            # Class axis is the outer dim -> plain VPU max/adds over C planes.
            m = jnp.max(score, axis=0, keepdims=True)
            e = jnp.exp(score - m)
            denom = jnp.sum(e, axis=0, keepdims=True)
            score = e * (1.0 / denom)                         # 1 divide / pixel

        tgt = tgt_ref[...].astype(jnp.int32)                  # [1, S_tile, 128]
        cls = lax.broadcasted_iota(jnp.int32, score.shape, 0) # [C, S_tile, 128]
        onehot = tgt == cls                                    # bool mask

        if mask_tail:
            # Only emitted on tiles overlapping the padded / out-of-range tail.
            row = lax.broadcasted_iota(jnp.int32, (1, s_tile, 128), 1)
            col = lax.broadcasted_iota(jnp.int32, (1, s_tile, 128), 2)
            valid = (base + row * 128 + col) < hw
            onehot = jnp.logical_and(onehot, valid)
            score = jnp.where(valid, score, 0.0)

        def fold(x):
            # [C, S_tile, 128] -> [C, 8, 128] via VPU adds over 8-row chunks
            # (reshape splits the sublane axis on a native (8,128) boundary).
            return jnp.sum(x.reshape(n_cls, s_tile // 8, 8, 128), axis=1)

        i_out[...] += fold(jnp.where(onehot, score, 0.0))      # intersect
        y_out[...] += fold(jnp.where(onehot, 1.0, 0.0))        # sum(target^2)
        z_out[...] += fold(score * score)                      # sum(score^2)

    if needs_mask:
        is_tail = base + tile_px > hw

        @pl.when(is_tail)
        def _masked():
            _accumulate(True)

        @pl.when(jnp.logical_not(is_tail))
        def _full():
            _accumulate(False)
    else:
        _accumulate(False)


def _vmem_plan():
    """Generation-aware (tile budget, vmem_limit) in bytes."""
    cap = 64 * 1024 * 1024
    try:
        info = pltpu.get_tpu_info()
        cap = int(getattr(info, "vmem_capacity_bytes", cap))
    except Exception:
        pass
    if cap >= 128 * 1024 * 1024:            # v5e / v6e: 128 MiB physical VMEM
        return 64 * 1024 * 1024, 100 * 1024 * 1024
    return 28 * 1024 * 1024, 44 * 1024 * 1024   # v7x (64 MiB) or unknown


def dice_loss(inputs, target, n_classes, weight=None, softmax=False,
              max_tile_rows=None):
    """inputs: [B, C, H, W] float, target: [B, H, W] int. Returns scalar loss."""
    B, C, H, W = inputs.shape
    assert C == n_classes
    HW = H * W

    # ---- layout: flatten HW, pad minimally to a multiple of 8*128 ----------
    s_needed = pl.cdiv(HW, 128)
    s_pad = ((s_needed + 7) // 8) * 8
    hw_pad = s_pad * 128

    score = inputs.reshape(B, C, HW)
    if jnp.issubdtype(target.dtype, jnp.integer):
        tgt = target.reshape(B, 1, HW)              # keep narrow label dtype
    else:
        tgt = target.reshape(B, 1, HW).astype(jnp.int32)
    if hw_pad != HW:
        pad = hw_pad - HW                           # <= 1023 pixels, rare
        score = jnp.pad(score, ((0, 0), (0, 0), (0, pad)))
        tgt = jnp.pad(tgt, ((0, 0), (0, 0), (0, pad)))
    score = score.reshape(B, C, s_pad, 128)
    tgt = tgt.reshape(B, 1, s_pad, 128)

    # ---- generation-aware tile sizing --------------------------------------
    vmem_budget, vmem_limit = _vmem_plan()
    in_isz = jnp.dtype(inputs.dtype).itemsize
    tgt_isz = jnp.dtype(tgt.dtype).itemsize
    # Double-buffered inputs + conservative bound on compiler-materialized
    # f32 elementwise temporaries (per pixel, across all C classes).
    per_pixel = 2 * (C * in_isz + tgt_isz) + 12 * C * 4 + 16
    fixed = 3 * 2 * C * 8 * 128 * 4 + (2 << 20)     # dbl-buffered outputs + slack
    pixels = max(8 * 128, (vmem_budget - fixed) // per_pixel)
    s_tile = int(min(4096, max(8, (pixels // 128) // 8 * 8)))
    if max_tile_rows is not None:                   # test / tuning override
        s_tile = max(8, (int(max_tile_rows) // 8) * 8)
    s_tile = min(s_tile, s_pad)

    tiles_total = pl.cdiv(s_pad, s_tile)
    num_chunks = 2 if tiles_total >= 2 else 1       # feed both v7x TensorCores
    tiles_per_chunk = pl.cdiv(tiles_total, num_chunks)

    # Masking is needed unless the tile grid covers HW exactly.
    needs_mask = (num_chunks * tiles_per_chunk * s_tile * 128) != HW

    last_blk = tiles_total - 1

    def _in_idx(b, c, t):
        # Clamp so a fully-out-of-range tile (over-coverage from chunking)
        # never issues an out-of-bounds block DMA; its contribution is
        # masked to zero inside the kernel anyway.
        return (b, 0, jnp.minimum(c * tiles_per_chunk + t, last_blk), 0)

    out_spec = pl.BlockSpec((None, None, C, 8, 128),
                            lambda b, c, t: (b, c, 0, 0, 0))

    kernel = functools.partial(
        _dice_kernel, hw=HW, s_tile=s_tile, tiles_per_chunk=tiles_per_chunk,
        apply_softmax=softmax, needs_mask=needs_mask)

    out_shape = tuple(
        jax.ShapeDtypeStruct((B, num_chunks, C, 8, 128), jnp.float32)
        for _ in range(3))

    i_p, y_p, z_p = pl.pallas_call(
        kernel,
        out_shape=out_shape,
        grid_spec=pltpu.PrefetchScalarGridSpec(
            num_scalar_prefetch=0,
            grid=(B, num_chunks, tiles_per_chunk),
            in_specs=[
                pl.BlockSpec((None, C, s_tile, 128), _in_idx),   # scores
                pl.BlockSpec((None, 1, s_tile, 128), _in_idx),   # labels
            ],
            out_specs=[out_spec, out_spec, out_spec],
        ),
        compiler_params=pltpu.CompilerParams(
            dimension_semantics=("parallel", "parallel", "arbitrary"),
            vmem_limit_bytes=vmem_limit),
    )(score, tgt)

    # Tiny finalize in plain JAX: combine per-(batch, chunk) vreg partials.
    intersect = jnp.sum(i_p, axis=(0, 1, 3, 4))      # [C]
    y_sum = jnp.sum(y_p, axis=(0, 1, 3, 4))
    z_sum = jnp.sum(z_p, axis=(0, 1, 3, 4))
    smooth = 1e-05
    dice = 1.0 - (2.0 * intersect + smooth) / (z_sum + y_sum + smooth)

    if weight is None:
        w = jnp.ones((n_classes,), jnp.float32)
    else:
        w = jnp.asarray(weight, dtype=jnp.float32)
    return jnp.sum(dice * w) / n_classes


def dice_loss_ref(inputs, target, n_classes, weight=None, softmax=False):
    """Pure-JAX reference mirroring the PyTorch module."""
    if softmax:
        inputs = jax.nn.softmax(inputs, axis=1)
    onehot = jax.nn.one_hot(target, n_classes, axis=1, dtype=jnp.float32)
    if weight is None:
        weight = [1.0] * n_classes
    smooth = 1e-05
    loss = 0.0
    for i in range(n_classes):
        s = inputs[:, i].astype(jnp.float32)
        t = onehot[:, i]
        intersect = jnp.sum(s * t)
        y_sum = jnp.sum(t * t)
        z_sum = jnp.sum(s * s)
        dice = 1.0 - (2.0 * intersect + smooth) / (z_sum + y_sum + smooth)
        loss = loss + dice * weight[i]
    return loss / n_classes


if __name__ == "__main__":
    # default path (softmax=False, weight=None), matching the module defaults
    B, C, H, W = 2, 4, 16, 16
    key = jax.random.PRNGKey(0)
    k1, k2 = jax.random.split(key)
    inputs = jax.random.normal(k1, (B, C, H, W), dtype=jnp.float32)
    target = jax.random.randint(k2, (B, H, W), 0, C, dtype=jnp.int32)

    out = jax.block_until_ready(dice_loss(inputs, target, n_classes=C, softmax=False))
    ref = dice_loss_ref(inputs, target, n_classes=C, softmax=False)
    assert jnp.allclose(out, ref, atol=1e-5, rtol=1e-5), (out, ref)

    # softmax=True path (class-axis softmax inside the kernel)
    out_sm = jax.block_until_ready(dice_loss(inputs, target, n_classes=C, softmax=True))
    ref_sm = dice_loss_ref(inputs, target, n_classes=C, softmax=True)
    assert jnp.allclose(out_sm, ref_sm, atol=1e-5, rtol=1e-5), (out_sm, ref_sm)

    # multi-tile + chunked + masked-tail + fully-out-of-range-tile path,
    # plus a non-trivial class weight (max_tile_rows forces small tiles).
    B2, C2, H2, W2 = 1, 3, 48, 48
    k3, k4 = jax.random.split(jax.random.PRNGKey(0))
    inp2 = jax.random.normal(k3, (B2, C2, H2, W2), dtype=jnp.float32)
    tgt2 = jax.random.randint(k4, (B2, H2, W2), 0, C2, dtype=jnp.int32)
    wts = [0.5, 1.0, 2.0]
    out_rg = jax.block_until_ready(
        dice_loss(inp2, tgt2, n_classes=C2, weight=wts, softmax=True,
                  max_tile_rows=8))
    ref_rg = dice_loss_ref(inp2, tgt2, n_classes=C2, weight=wts, softmax=True)
    assert jnp.allclose(out_rg, ref_rg, atol=1e-5, rtol=1e-5), (out_rg, ref_rg)

    print("KERNEL_OK")
</pallas_src>

<mosaic_0001>
module attributes {stable_mosaic.version = 11 : i64} {
  func.func @_dice_kernel(%arg0: i32, %arg1: i32, %arg2: i32, %arg3: memref<1x4x8x128xf32, #tpu.memory_space<vmem>>, %arg4: memref<1x1x8x128xi32, #tpu.memory_space<vmem>>, %arg5: memref<1x1x4x8x128xf32, #tpu.memory_space<vmem>>, %arg6: memref<1x1x4x8x128xf32, #tpu.memory_space<vmem>>, %arg7: memref<1x1x4x8x128xf32, #tpu.memory_space<vmem>>) attributes {dimension_semantics = [#tpu.dimension_semantics<parallel>, #tpu.dimension_semantics<parallel>, #tpu.dimension_semantics<arbitrary>], iteration_bounds = array<i64: 2, 1, 1>, scalar_prefetch = 0 : i64, scratch_operands = 0 : i64, tpu.core_type = #tpu.core_type<tc>, window_params = [{transform_indices = @transform_0, window_bounds = array<i64: 1, 4, 8, 128>}, {transform_indices = @transform_1, window_bounds = array<i64: 1, 1, 8, 128>}, {transform_indices = @transform_2, window_bounds = array<i64: 1, 1, 4, 8, 128>}, {transform_indices = @transform_3, window_bounds = array<i64: 1, 1, 4, 8, 128>}, {transform_indices = @transform_4, window_bounds = array<i64: 1, 1, 4, 8, 128>}]} {
    %c0_i32 = arith.constant 0 : i32
    %0 = arith.cmpi eq, %arg2, %c0_i32 : i32
    %1 = arith.extui %0 : i1 to i32
    %c0_i32_0 = arith.constant 0 : i32
    %2 = arith.cmpi ne, %1, %c0_i32_0 : i32
    scf.if %2 {
      %cst = arith.constant 0.000000e+00 : f32
      %13 = vector.broadcast %cst : f32 to vector<4x8x128xf32>
      %c0 = arith.constant 0 : index
      %c0_4 = arith.constant 0 : index
      %c0_5 = arith.constant 0 : index
      %c0_6 = arith.constant 0 : index
      %c0_7 = arith.constant 0 : index
      %14 = vector.load %arg5[%c0, %c0_4, %c0_5, %c0_6, %c0_7] : memref<1x1x4x8x128xf32, #tpu.memory_space<vmem>>, vector<1x1x4x8x128xf32>
      %15 = vector.shape_cast %14 : vector<1x1x4x8x128xf32> to vector<4x8x128xf32>
      %16 = vector.shape_cast %13 : vector<4x8x128xf32> to vector<1x1x4x8x128xf32>
      tpu.vector_store %arg5[%c0, %c0_4, %c0_5, %c0_6, %c0_7], %16 {strides = array<i32>} : memref<1x1x4x8x128xf32, #tpu.memory_space<vmem>>, vector<1x1x4x8x128xf32>,
      %cst_8 = arith.constant 0.000000e+00 : f32
      %17 = vector.broadcast %cst_8 : f32 to vector<4x8x128xf32>
      %c0_9 = arith.constant 0 : index
      %c0_10 = arith.constant 0 : index
      %c0_11 = arith.constant 0 : index
      %c0_12 = arith.constant 0 : index
      %c0_13 = arith.constant 0 : index
      %18 = vector.load %arg6[%c0_9, %c0_10, %c0_11, %c0_12, %c0_13] : memref<1x1x4x8x128xf32, #tpu.memory_space<vmem>>, vector<1x1x4x8x128xf32>
      %19 = vector.shape_cast %18 : vector<1x1x4x8x128xf32> to vector<4x8x128xf32>
      %20 = vector.shape_cast %17 : vector<4x8x128xf32> to vector<1x1x4x8x128xf32>
      tpu.vector_store %arg6[%c0_9, %c0_10, %c0_11, %c0_12, %c0_13], %20 {strides = array<i32>} : memref<1x1x4x8x128xf32, #tpu.memory_space<vmem>>, vector<1x1x4x8x128xf32>,
      %cst_14 = arith.constant 0.000000e+00 : f32
      %21 = vector.broadcast %cst_14 : f32 to vector<4x8x128xf32>
      %c0_15 = arith.constant 0 : index
      %c0_16 = arith.constant 0 : index
      %c0_17 = arith.constant 0 : index
      %c0_18 = arith.constant 0 : index
      %c0_19 = arith.constant 0 : index
      %22 = vector.load %arg7[%c0_15, %c0_16, %c0_17, %c0_18, %c0_19] : memref<1x1x4x8x128xf32, #tpu.memory_space<vmem>>, vector<1x1x4x8x128xf32>
      %23 = vector.shape_cast %22 : vector<1x1x4x8x128xf32> to vector<4x8x128xf32>
      %24 = vector.shape_cast %21 : vector<4x8x128xf32> to vector<1x1x4x8x128xf32>
      tpu.vector_store %arg7[%c0_15, %c0_16, %c0_17, %c0_18, %c0_19], %24 {strides = array<i32>} : memref<1x1x4x8x128xf32, #tpu.memory_space<vmem>>, vector<1x1x4x8x128xf32>,
    } else {
    }
    %c1_i32 = arith.constant 1 : i32
    %3 = arith.muli %arg1, %c1_i32 : i32
    %4 = arith.addi %3, %arg2 : i32
    %c1024_i32 = arith.constant 1024 : i32
    %5 = arith.muli %4, %c1024_i32 : i32
    %c1024_i32_1 = arith.constant 1024 : i32
    %6 = arith.addi %5, %c1024_i32_1 : i32
    %c256_i32 = arith.constant 256 : i32
    %7 = arith.cmpi sgt, %6, %c256_i32 : i32
    %8 = arith.extui %7 : i1 to i32
    %c0_i32_2 = arith.constant 0 : i32
    %9 = arith.cmpi ne, %8, %c0_i32_2 : i32
    scf.if %9 {
      %c0 = arith.constant 0 : index
      %c0_4 = arith.constant 0 : index
      %c0_5 = arith.constant 0 : index
      %c0_6 = arith.constant 0 : index
      %13 = vector.load %arg3[%c0, %c0_4, %c0_5, %c0_6] : memref<1x4x8x128xf32, #tpu.memory_space<vmem>>, vector<1x4x8x128xf32>
      %14 = vector.shape_cast %13 : vector<1x4x8x128xf32> to vector<4x8x128xf32>
      %c0_7 = arith.constant 0 : index
      %c0_8 = arith.constant 0 : index
      %c0_9 = arith.constant 0 : index
      %c0_10 = arith.constant 0 : index
      %15 = vector.load %arg4[%c0_7, %c0_8, %c0_9, %c0_10] : memref<1x1x8x128xi32, #tpu.memory_space<vmem>>, vector<1x1x8x128xi32>
      %16 = vector.shape_cast %15 : vector<1x1x8x128xi32> to vector<1x8x128xi32>
      %17 = tpu.iota {dimensions = array<i32: 0>} : vector<4x8x128xi32>
      %18 = vector.broadcast %16 : vector<1x8x128xi32> to vector<4x8x128xi32>
      %19 = arith.cmpi eq, %18, %17 : vector<4x8x128xi32>
      %20 = tpu.iota {dimensions = array<i32: 1>} : vector<1x8x128xi32>
      %21 = tpu.iota {dimensions = array<i32: 2>} : vector<1x8x128xi32>
      %c128_i32 = arith.constant 128 : i32
      %22 = vector.broadcast %c128_i32 : i32 to vector<1x8x128xi32>
      %23 = arith.muli %20, %22 : vector<1x8x128xi32>
      %24 = vector.broadcast %5 : i32 to vector<1x8x128xi32>
      %25 = arith.addi %24, %23 : vector<1x8x128xi32>
      %26 = arith.addi %25, %21 : vector<1x8x128xi32>
      %c256_i32_11 = arith.constant 256 : i32
      %27 = vector.broadcast %c256_i32_11 : i32 to vector<1x8x128xi32>
      %28 = arith.cmpi slt, %26, %27 : vector<1x8x128xi32>
      %29 = vector.broadcast %28 : vector<1x8x128xi1> to vector<4x8x128xi1>
      %30 = arith.andi %19, %29 : vector<4x8x128xi1>
      %cst = arith.constant 0.000000e+00 : f32
      %31 = vector.shape_cast %28 : vector<1x8x128xi1> to vector<1x8x128xi1>
      %32 = vector.broadcast %31 : vector<1x8x128xi1> to vector<4x8x128xi1>
      %33 = vector.broadcast %cst : f32 to vector<4x8x128xf32>
      %34 = arith.select %32, %14, %33 : vector<4x8x128xi1>, vector<4x8x128xf32>
      %c0_12 = arith.constant 0 : index
      %c0_13 = arith.constant 0 : index
      %c0_14 = arith.constant 0 : index
      %c0_15 = arith.constant 0 : index
      %c0_16 = arith.constant 0 : index
      %35 = vector.load %arg5[%c0_12, %c0_13, %c0_14, %c0_15, %c0_16] : memref<1x1x4x8x128xf32, #tpu.memory_space<vmem>>, vector<1x1x4x8x128xf32>
      %36 = vector.shape_cast %35 : vector<1x1x4x8x128xf32> to vector<4x8x128xf32>
      %cst_17 = arith.constant 0.000000e+00 : f32
      %37 = vector.broadcast %cst_17 : f32 to vector<4x8x128xf32>
      %38 = arith.select %30, %34, %37 : vector<4x8x128xi1>, vector<4x8x128xf32>
      %39 = vector.shape_cast %38 : vector<4x8x128xf32> to vector<4x1x8x128xf32>
      %cst_18 = arith.constant dense<0.000000e+00> : vector<4x8x128xf32>
      %40 = vector.multi_reduction <add>, %39, %cst_18 [1] : vector<4x1x8x128xf32> to vector<4x8x128xf32>
      %41 = arith.addf %36, %40 : vector<4x8x128xf32>
      %c0_19 = arith.constant 0 : index
      %c0_20 = arith.constant 0 : index
      %c0_21 = arith.constant 0 : index
      %c0_22 = arith.constant 0 : index
      %c0_23 = arith.constant 0 : index
      %42 = vector.load %arg5[%c0_19, %c0_20, %c0_21, %c0_22, %c0_23] : memref<1x1x4x8x128xf32, #tpu.memory_space<vmem>>, vector<1x1x4x8x128xf32>
      %43 = vector.shape_cast %42 : vector<1x1x4x8x128xf32> to vector<4x8x128xf32>
      %44 = vector.shape_cast %41 : vector<4x8x128xf32> to vector<1x1x4x8x128xf32>
      tpu.vector_store %arg5[%c0_19, %c0_20, %c0_21, %c0_22, %c0_23], %44 {strides = array<i32>} : memref<1x1x4x8x128xf32, #tpu.memory_space<vmem>>, vector<1x1x4x8x128xf32>,
      %c0_24 = arith.constant 0 : index
      %c0_25 = arith.constant 0 : index
      %c0_26 = arith.constant 0 : index
      %c0_27 = arith.constant 0 : index
      %c0_28 = arith.constant 0 : index
      %45 = vector.load %arg6[%c0_24, %c0_25, %c0_26, %c0_27, %c0_28] : memref<1x1x4x8x128xf32, #tpu.memory_space<vmem>>, vector<1x1x4x8x128xf32>
      %46 = vector.shape_cast %45 : vector<1x1x4x8x128xf32> to vector<4x8x128xf32>
      %cst_29 = arith.constant 1.000000e+00 : f32
      %cst_30 = arith.constant 0.000000e+00 : f32
      %47 = vector.broadcast %cst_29 : f32 to vector<4x8x128xf32>
      %48 = vector.broadcast %cst_30 : f32 to vector<4x8x128xf32>
      %49 = arith.select %30, %47, %48 : vector<4x8x128xi1>, vector<4x8x128xf32>
      %50 = vector.shape_cast %49 : vector<4x8x128xf32> to vector<4x1x8x128xf32>
      %cst_31 = arith.constant dense<0.000000e+00> : vector<4x8x128xf32>
      %51 = vector.multi_reduction <add>, %50, %cst_31 [1] : vector<4x1x8x128xf32> to vector<4x8x128xf32>
      %52 = arith.addf %46, %51 : vector<4x8x128xf32>
      %c0_32 = arith.constant 0 : index
      %c0_33 = arith.constant 0 : index
      %c0_34 = arith.constant 0 : index
      %c0_35 = arith.constant 0 : index
      %c0_36 = arith.constant 0 : index
      %53 = vector.load %arg6[%c0_32, %c0_33, %c0_34, %c0_35, %c0_36] : memref<1x1x4x8x128xf32, #tpu.memory_space<vmem>>, vector<1x1x4x8x128xf32>
      %54 = vector.shape_cast %53 : vector<1x1x4x8x128xf32> to vector<4x8x128xf32>
      %55 = vector.shape_cast %52 : vector<4x8x128xf32> to vector<1x1x4x8x128xf32>
      tpu.vector_store %arg6[%c0_32, %c0_33, %c0_34, %c0_35, %c0_36], %55 {strides = array<i32>} : memref<1x1x4x8x128xf32, #tpu.memory_space<vmem>>, vector<1x1x4x8x128xf32>,
      %c0_37 = arith.constant 0 : index
      %c0_38 = arith.constant 0 : index
      %c0_39 = arith.constant 0 : index
      %c0_40 = arith.constant 0 : index
      %c0_41 = arith.constant 0 : index
      %56 = vector.load %arg7[%c0_37, %c0_38, %c0_39, %c0_40, %c0_41] : memref<1x1x4x8x128xf32, #tpu.memory_space<vmem>>, vector<1x1x4x8x128xf32>
      %57 = vector.shape_cast %56 : vector<1x1x4x8x128xf32> to vector<4x8x128xf32>
      %58 = arith.mulf %34, %34 : vector<4x8x128xf32>
      %59 = vector.shape_cast %58 : vector<4x8x128xf32> to vector<4x1x8x128xf32>
      %cst_42 = arith.constant dense<0.000000e+00> : vector<4x8x128xf32>
      %60 = vector.multi_reduction <add>, %59, %cst_42 [1] : vector<4x1x8x128xf32> to vector<4x8x128xf32>
      %61 = arith.addf %57, %60 : vector<4x8x128xf32>
      %c0_43 = arith.constant 0 : index
      %c0_44 = arith.constant 0 : index
      %c0_45 = arith.constant 0 : index
      %c0_46 = arith.constant 0 : index
      %c0_47 = arith.constant 0 : index
      %62 = vector.load %arg7[%c0_43, %c0_44, %c0_45, %c0_46, %c0_47] : memref<1x1x4x8x128xf32, #tpu.memory_space<vmem>>, vector<1x1x4x8x128xf32>
      %63 = vector.shape_cast %62 : vector<1x1x4x8x128xf32> to vector<4x8x128xf32>
      %64 = vector.shape_cast %61 : vector<4x8x128xf32> to vector<1x1x4x8x128xf32>
      tpu.vector_store %arg7[%c0_43, %c0_44, %c0_45, %c0_46, %c0_47], %64 {strides = array<i32>} : memref<1x1x4x8x128xf32, #tpu.memory_space<vmem>>, vector<1x1x4x8x128xf32>,
    } else {
    }
    %true = arith.constant true
    %10 = arith.xori %7, %true : i1
    %11 = arith.extui %10 : i1 to i32
    %c0_i32_3 = arith.constant 0 : i32
    %12 = arith.cmpi ne, %11, %c0_i32_3 : i32
    scf.if %12 {
      %c0 = arith.constant 0 : index
      %c0_4 = arith.constant 0 : index
      %c0_5 = arith.constant 0 : index
      %c0_6 = arith.constant 0 : index
      %13 = vector.load %arg3[%c0, %c0_4, %c0_5, %c0_6] : memref<1x4x8x128xf32, #tpu.memory_space<vmem>>, vector<1x4x8x128xf32>
      %14 = vector.shape_cast %13 : vector<1x4x8x128xf32> to vector<4x8x128xf32>
      %c0_7 = arith.constant 0 : index
      %c0_8 = arith.constant 0 : index
      %c0_9 = arith.constant 0 : index
      %c0_10 = arith.constant 0 : index
      %15 = vector.load %arg4[%c0_7, %c0_8, %c0_9, %c0_10] : memref<1x1x8x128xi32, #tpu.memory_space<vmem>>, vector<1x1x8x128xi32>
      %16 = vector.shape_cast %15 : vector<1x1x8x128xi32> to vector<1x8x128xi32>
      %17 = tpu.iota {dimensions = array<i32: 0>} : vector<4x8x128xi32>
      %18 = vector.broadcast %16 : vector<1x8x128xi32> to vector<4x8x128xi32>
      %19 = arith.cmpi eq, %18, %17 : vector<4x8x128xi32>
      %c0_11 = arith.constant 0 : index
      %c0_12 = arith.constant 0 : index
      %c0_13 = arith.constant 0 : index
      %c0_14 = arith.constant 0 : index
      %c0_15 = arith.constant 0 : index
      %20 = vector.load %arg5[%c0_11, %c0_12, %c0_13, %c0_14, %c0_15] : memref<1x1x4x8x128xf32, #tpu.memory_space<vmem>>, vector<1x1x4x8x128xf32>
      %21 = vector.shape_cast %20 : vector<1x1x4x8x128xf32> to vector<4x8x128xf32>
      %cst = arith.constant 0.000000e+00 : f32
      %22 = vector.broadcast %cst : f32 to vector<4x8x128xf32>
      %23 = arith.select %19, %14, %22 : vector<4x8x128xi1>, vector<4x8x128xf32>
      %24 = vector.shape_cast %23 : vector<4x8x128xf32> to vector<4x1x8x128xf32>
      %cst_16 = arith.constant dense<0.000000e+00> : vector<4x8x128xf32>
      %25 = vector.multi_reduction <add>, %24, %cst_16 [1] : vector<4x1x8x128xf32> to vector<4x8x128xf32>
      %26 = arith.addf %21, %25 : vector<4x8x128xf32>
      %c0_17 = arith.constant 0 : index
      %c0_18 = arith.constant 0 : index
      %c0_19 = arith.constant 0 : index
      %c0_20 = arith.constant 0 : index
      %c0_21 = arith.constant 0 : index
      %27 = vector.load %arg5[%c0_17, %c0_18, %c0_19, %c0_20, %c0_21] : memref<1x1x4x8x128xf32, #tpu.memory_space<vmem>>, vector<1x1x4x8x128xf32>
      %28 = vector.shape_cast %27 : vector<1x1x4x8x128xf32> to vector<4x8x128xf32>
      %29 = vector.shape_cast %26 : vector<4x8x128xf32> to vector<1x1x4x8x128xf32>
      tpu.vector_store %arg5[%c0_17, %c0_18, %c0_19, %c0_20, %c0_21], %29 {strides = array<i32>} : memref<1x1x4x8x128xf32, #tpu.memory_space<vmem>>, vector<1x1x4x8x128xf32>,
      %c0_22 = arith.constant 0 : index
      %c0_23 = arith.constant 0 : index
      %c0_24 = arith.constant 0 : index
      %c0_25 = arith.constant 0 : index
      %c0_26 = arith.constant 0 : index
      %30 = vector.load %arg6[%c0_22, %c0_23, %c0_24, %c0_25, %c0_26] : memref<1x1x4x8x128xf32, #tpu.memory_space<vmem>>, vector<1x1x4x8x128xf32>
      %31 = vector.shape_cast %30 : vector<1x1x4x8x128xf32> to vector<4x8x128xf32>
      %cst_27 = arith.constant 1.000000e+00 : f32
      %cst_28 = arith.constant 0.000000e+00 : f32
      %32 = vector.broadcast %cst_27 : f32 to vector<4x8x128xf32>
      %33 = vector.broadcast %cst_28 : f32 to vector<4x8x128xf32>
      %34 = arith.select %19, %32, %33 : vector<4x8x128xi1>, vector<4x8x128xf32>
      %35 = vector.shape_cast %34 : vector<4x8x128xf32> to vector<4x1x8x128xf32>
      %cst_29 = arith.constant dense<0.000000e+00> : vector<4x8x128xf32>
      %36 = vector.multi_reduction <add>, %35, %cst_29 [1] : vector<4x1x8x128xf32> to vector<4x8x128xf32>
      %37 = arith.addf %31, %36 : vector<4x8x128xf32>
      %c0_30 = arith.constant 0 : index
      %c0_31 = arith.constant 0 : index
      %c0_32 = arith.constant 0 : index
      %c0_33 = arith.constant 0 : index
      %c0_34 = arith.constant 0 : index
      %38 = vector.load %arg6[%c0_30, %c0_31, %c0_32, %c0_33, %c0_34] : memref<1x1x4x8x128xf32, #tpu.memory_space<vmem>>, vector<1x1x4x8x128xf32>
      %39 = vector.shape_cast %38 : vector<1x1x4x8x128xf32> to vector<4x8x128xf32>
      %40 = vector.shape_cast %37 : vector<4x8x128xf32> to vector<1x1x4x8x128xf32>
      tpu.vector_store %arg6[%c0_30, %c0_31, %c0_32, %c0_33, %c0_34], %40 {strides = array<i32>} : memref<1x1x4x8x128xf32, #tpu.memory_space<vmem>>, vector<1x1x4x8x128xf32>,
      %c0_35 = arith.constant 0 : index
      %c0_36 = arith.constant 0 : index
      %c0_37 = arith.constant 0 : index
      %c0_38 = arith.constant 0 : index
      %c0_39 = arith.constant 0 : index
      %41 = vector.load %arg7[%c0_35, %c0_36, %c0_37, %c0_38, %c0_39] : memref<1x1x4x8x128xf32, #tpu.memory_space<vmem>>, vector<1x1x4x8x128xf32>
      %42 = vector.shape_cast %41 : vector<1x1x4x8x128xf32> to vector<4x8x128xf32>
      %43 = arith.mulf %14, %14 : vector<4x8x128xf32>
      %44 = vector.shape_cast %43 : vector<4x8x128xf32> to vector<4x1x8x128xf32>
      %cst_40 = arith.constant dense<0.000000e+00> : vector<4x8x128xf32>
      %45 = vector.multi_reduction <add>, %44, %cst_40 [1] : vector<4x1x8x128xf32> to vector<4x8x128xf32>
      %46 = arith.addf %42, %45 : vector<4x8x128xf32>
      %c0_41 = arith.constant 0 : index
      %c0_42 = arith.constant 0 : index
      %c0_43 = arith.constant 0 : index
      %c0_44 = arith.constant 0 : index
      %c0_45 = arith.constant 0 : index
      %47 = vector.load %arg7[%c0_41, %c0_42, %c0_43, %c0_44, %c0_45] : memref<1x1x4x8x128xf32, #tpu.memory_space<vmem>>, vector<1x1x4x8x128xf32>
      %48 = vector.shape_cast %47 : vector<1x1x4x8x128xf32> to vector<4x8x128xf32>
      %49 = vector.shape_cast %46 : vector<4x8x128xf32> to vector<1x1x4x8x128xf32>
      tpu.vector_store %arg7[%c0_41, %c0_42, %c0_43, %c0_44, %c0_45], %49 {strides = array<i32>} : memref<1x1x4x8x128xf32, #tpu.memory_space<vmem>>, vector<1x1x4x8x128xf32>,
    } else {
    }
    return
  }
  func.func @transform_0(%arg0: i32, %arg1: i32, %arg2: i32) -> (i32, i32, i32, i32) {
    %c1_i32 = arith.constant 1 : i32
    %0 = arith.muli %arg1, %c1_i32 : i32
    %1 = arith.addi %0, %arg2 : i32
    %c0_i32 = arith.constant 0 : i32
    %2 = arith.minsi %1, %c0_i32 : i32
    %c0_i32_0 = arith.constant 0 : i32
    %c0_i32_1 = arith.constant 0 : i32
    %c0_i32_2 = arith.constant 0 : i32
    return %arg0, %c0_i32_0, %2, %c0_i32_1 : i32, i32, i32, i32
  }
  func.func @transform_1(%arg0: i32, %arg1: i32, %arg2: i32) -> (i32, i32, i32, i32) {
    %c1_i32 = arith.constant 1 : i32
    %0 = arith.muli %arg1, %c1_i32 : i32
    %1 = arith.addi %0, %arg2 : i32
    %c0_i32 = arith.constant 0 : i32
    %2 = arith.minsi %1, %c0_i32 : i32
    %c0_i32_0 = arith.constant 0 : i32
    %c0_i32_1 = arith.constant 0 : i32
    %c0_i32_2 = arith.constant 0 : i32
    return %arg0, %c0_i32_0, %2, %c0_i32_1 : i32, i32, i32, i32
  }
  func.func @transform_2(%arg0: i32, %arg1: i32, %arg2: i32) -> (i32, i32, i32, i32, i32) {
    %c0_i32 = arith.constant 0 : i32
    %c0_i32_0 = arith.constant 0 : i32
    %c0_i32_1 = arith.constant 0 : i32
    %c0_i32_2 = arith.constant 0 : i32
    return %arg0, %arg1, %c0_i32, %c0_i32_0, %c0_i32_1 : i32, i32, i32, i32, i32
  }
  func.func @transform_3(%arg0: i32, %arg1: i32, %arg2: i32) -> (i32, i32, i32, i32, i32) {
    %c0_i32 = arith.constant 0 : i32
    %c0_i32_0 = arith.constant 0 : i32
    %c0_i32_1 = arith.constant 0 : i32
    %c0_i32_2 = arith.constant 0 : i32
    return %arg0, %arg1, %c0_i32, %c0_i32_0, %c0_i32_1 : i32, i32, i32, i32, i32
  }
  func.func @transform_4(%arg0: i32, %arg1: i32, %arg2: i32) -> (i32, i32, i32, i32, i32) {
    %c0_i32 = arith.constant 0 : i32
    %c0_i32_0 = arith.constant 0 : i32
    %c0_i32_1 = arith.constant 0 : i32
    %c0_i32_2 = arith.constant 0 : i32
    return %arg0, %arg1, %c0_i32, %c0_i32_0, %c0_i32_1 : i32, i32, i32, i32, i32
  }
}

</mosaic_0001>

<bundles_post_ra>
// kernel: tpu_custom_call.1
= control target key start
LH: loop header
LB: loop body
LE: loop exit
PB: predicated region body
PF: predicated region fallthrough
CT: control target
= control target key end

     0   :  { %s1409_s0 = inlined_call_operand.hbm [shape: f32[2,4,8,128], index: 0, kind: input, shape index: {}]   ;;  %s1410_s1 = inlined_call_operand.hbm [shape: s32[2,1,8,128], index: 1, kind: input, shape index: {}]   ;;  %s1411_s2 = inlined_call_operand.hbm [shape: f32[2,1,4,8,128], index: 2, kind: output, shape index: {0}]   ;;  %s1412_s3 = inlined_call_operand.hbm [shape: f32[2,1,4,8,128], index: 3, kind: output, shape index: {1}]   ;;  %s1413_s4 = inlined_call_operand.hbm [shape: f32[2,1,4,8,128], index: 4, kind: output, shape index: {2}]  }
   0x1   :  { %1416 = sst [smem:[#allocation17_spill]] %s1409_s0 }
   0x2   :  { %10 = vsyncpa [#allocation3], 0 }
   0x3   :  { %12 = vsyncpa [#allocation3 + $0x1], 0 }
   0x4   :  { %13 = vsyncpa [#allocation6], 0 }
   0x5   :  { %15 = vsyncpa [#allocation6 + $0x1], 0 }
   0x6   :  { %16 = vsyncpa [#allocation4], 0 }
   0x7   :  { %18 = vsyncpa [#allocation4 + $0x1], 0 }
   0x8   :  { %19 = vsyncpa [#allocation9], 0 }
   0x9   :  { %21 = vsyncpa [#allocation9 + $0x1], 0  ;;  %s1097_s15 = smov 0   ;;  %s1099_s16 = smov 0  }
   0xa   :  { %s1101_s17 = smov 0   ;;  %s1103_s18 = smov 0  }
   0xb   :  { %s1105_s19 = smov 0   ;;  %s1107_s20 = smov 0  }
   0xc LB: > { %s1128_s21 = sadd.s32 4294967295, %s1060_s20   ;;  %s1414_s22 = sadd.s32 4294967294, %s1060_s20   ;;  %s1060_s20 = sphi %s1107_s20, %s27_s20   ;;  %s1056_s19 = sphi %s1105_s19, %s1441_s19   ;;  %s1052_s18 = sphi %s1103_s18, %s1440_s18   ;;  %s1048_s17 = sphi %s1101_s17, %s1439_s17   ;;  %s1044_s16 = sphi %s1099_s16, %s1438_s16   ;;  %s1040_s15 = sphi %s1097_s15, %s1437_s15  }
   0xd   : > { %s46_s23 = sadd.s32 1, %s1056_s19  ;;  %s61_s24 = sadd.s32 1, %s1048_s17 }
   0xe   : > { %p48_p0 = scmp.ge.s32.totalorder %s46_s23, 2  ;;  %p68_p1 = scmp.ne.s32.totalorder %s1048_s17, %s1044_s16 }
   0xf   : > { %p69_p2 = scmp.eq.s32.totalorder %s1060_s20, 0  ;;  %p74_p3 = scmp.ne.s32.totalorder %s1044_s16, %s1040_s15 }
  0x10   : > { %s1443_s23 = smov (%p48_p0, %s46_s23), 0  ;;  %p75_p5 = scmp.eq.s32.totalorder %s1128_s21, 0 }
  0x11   : > { %1417 = sst [smem:[#allocation15_spill]] %s1443_s23  ;;  %p1140_p4 = por %p69_p2, %p68_p1 }
  0x12   : > { %s56_s26 = ssub.s32 %s1056_s19, %s1443_s23  ;;  %p134_p6 = scmp.eq.s32.totalorder %s1128_s21, 1 }
  0x13   : > { %p59_p7 = scmp.eq.s32.totalorder %s56_s26, 0  ;;  %p1148_p8 = por %p75_p5, %p74_p3 }
  0x14   : > { %p1152_p9 = por %p134_p6, %p68_p1  ;;  %p140_p10 = scmp.eq.s32.totalorder %s1414_s22, 1 }
  0x15   : > { %s1159_s29 = scalar_select %p59_p7, %s1048_s17, %s61_s24  }
  0x16   : > { %p1161_p11 = por %p140_p10, %p74_p3  ;;  %p755_p12 = scmp.ge.s32.totalorder %s1060_s20, 2 }
  0x17   : > { %1421 = sst [smem:[#allocation16_spill]] %s1159_s29  ;;  %p809_p13 = scmp.lt.s32.totalorder %s1060_s20, 2 }
  0x18   : > { %s1168_s5 = sand.u32 1, %s1048_s17   ;;  %s778_s7 = sshll.u32 %s1056_s19, 9 }
  0x19   : > { %s756_s6 = sshll.u32 %s1168_s5, 5  ;;  %s1423_s0 = sld [smem:[#allocation17_spill]] }
  0x1a   : > { %s220_s11 = scalar_lea.vmem [#allocation2], %s756_s6  ;;  %p1177_p0 = pnand %p809_p13, %p1140_p4 }
  0x1b   : > { %s231_s12 = sshll.u32 %s220_s11, 4  ;;  %p761_p1 = scmp.ge.s32.totalorder %s1060_s20, 1  ;;  %s232_s12 = int_to_ptr.vmem [resolvable:$true] %s231_s12 }
  0x1c   : > { %s217_s14 = scalar_lea.sflag [#allocation3], %s1168_s5  ;;  %p866_p2 = pneg %p1177_p0 }
  0x1d   : > { %s877_s24 = scalar_lea.vmem %s232_s12, 512  ;;  %s1062_s26 = smov [#allocation2]  }
  0x1e   : > { %p878_p3 = scmp.ne.s32.totalorder %s232_s12, %s877_s24  ;;  %s882_s6 = sshll.u32 %s1062_s26, 4  ;;  %s883_s6 = int_to_ptr.vmem [resolvable:$false] %s882_s6 }
  0x1f   : > { %s230_s10 = scalar_lea.hbm %s1423_s0, %s778_s7  ;;  %s884_s25 = scalar_lea.vmem %s883_s6, 1024 }
  0x20   : > { %p880_p5 = pnand %p878_p3, %p866_p2  ;;  %p885_p4 = scmp.lt.s32.totalorder %s232_s12, %s883_s6 }
  0x21   : > { %p886_p7 = scmp.lt.s32.totalorder %s884_s25, %s877_s24 }
  0x22   : > { %p881_p6 = pneg %p880_p5 }
  0x23   : > { %p887_p10 = por %p886_p7, %p885_p4 }
  0x25   : > { %p888_p13 = pnand %p887_p10, %p881_p6 }
  0x27   : > { %891 = shalt.err (!%p888_p13)
}
  0x28   : > { %s1063_s7 = smov 128   ;;  %s1064_s8 = smov 8  }
  0x29   : > { %795 = dma.hbm_to_vmem [thread:$0]  (!%p1177_p0), %s230_s10, 512, %s232_s12, %s217_s14, %s1063_s7, %s1063_s7, %s1064_s8  }
  0x2a   : > { %p261_p3 = scmp.lt.s32.totalorder %s1060_s20, 3  ;;  %s759_s9 = sshll.u32 %s1168_s5, 3 }
  0x2b   : > { %s760_s11 = sshll.u32 %s1056_s19, 7  ;;  %s245_s22 = scalar_lea.vmem [#allocation5], %s759_s9 }
  0x2c   : > { %p1195_p5 = pnand %p761_p1, %p261_p3  ;;  %s254_s25 = scalar_lea.hbm %s1410_s1, %s760_s11 }
  0x2d   : > { %s256_s0 = sshll.u32 %s245_s22, 4  ;;  %s242_s23 = scalar_lea.sflag [#allocation6], %s1168_s5  ;;  %s257_s0 = int_to_ptr.vmem [resolvable:$true] %s256_s0 }
  0x2e   : > { %s905_s29 = scalar_lea.vmem %s257_s0, 128  ;;  %s1065_s10 = smov [#allocation5]  }
  0x2f   : > { %p906_p6 = scmp.ne.s32.totalorder %s257_s0, %s905_s29  ;;  %s910_s12 = sshll.u32 %s1065_s10, 4  ;;  %s911_s12 = int_to_ptr.vmem [resolvable:$false] %s910_s12 }
  0x30   : > { %s912_s14 = scalar_lea.vmem %s911_s12, 256  ;;  %p913_p1 = scmp.lt.s32.totalorder %s257_s0, %s911_s12 }
  0x31   : > { %p908_p4 = pnand %p906_p6, %p866_p2  ;;  %p914_p10 = scmp.lt.s32.totalorder %s912_s14, %s905_s29 }
  0x33   : > { %p909_p7 = pneg %p908_p4  ;;  %p915_p13 = por %p914_p10, %p913_p1 }
  0x35   : > { %p916_p3 = pnand %p915_p13, %p909_p7 }
  0x37   : > { %919 = shalt.err (!%p916_p3)
}
  0x38   : > { %798 = dma.hbm_to_vmem [thread:$0]  (!%p1177_p0), %s254_s25, 128, %s257_s0, %s242_s23  }
  0x39   : > { %265 = sbr.rel (%p1195_p5) target bundleno = 144 (0x90), region = 28  ;;  %s1211_s22 = sand.u32 (!%p1195_p5), 1, %s1044_s16  }
  0x3a   : > { %s1214_s5 = sshll.u32 (!%p1195_p5), %s1211_s22, 5  ;;  %s268_s7 = scalar_lea.sflag (!%p1195_p5), [#allocation3], %s1211_s22 }
  0x3b   : > { %s271_s29 = scalar_lea.vmem (!%p1195_p5), [#allocation2], %s1214_s5 }
  0x3e   : > { %1023 = dma.done.wait (%p1148_p8), %s268_s7, 512  }
  0x3f   : > { %1025 = vsyncadd (%p1148_p8), %s268_s7, 4294966784  ;;  %s763_s0 = sshll.u32 %s1211_s22, 3  ;;  %s277_s23 = scalar_lea.sflag [#allocation6], %s1211_s22 }
  0x40   : > { %s280_s13 = scalar_lea.vmem [#allocation5], %s763_s0 }
  0x41   : > { %1027 = dma.done.wait (%p1148_p8), %s277_s23, 128  }
  0x42   : > { %1029 = vsyncadd (%p1148_p8), %s277_s23, 4294967168  ;;  %v358_v0 = vlaneseq  ;;  %v353_v5 = vld [vmem:[%s280_s13] sm:$0xff]  ;;  %s515_s8 = sand.u32 1, %s1128_s21   ;;  %v351_v8 = vld [vmem:[%s271_s29 + $0x10] sm:$0xff]  ;;  %v1066_v14 = vmov 0.0   ;;  %s1248_s27 = sshll.u32 %s1052_s18, 9 }
  0x43   : > { %v349_v6 = vld [vmem:[%s271_s29] sm:$0xff]  ;;  %v350_v7 = vld [vmem:[%s271_s29 + $0x8] sm:$0xff]  ;;  %vm354_vm0 = vcmp.eq.s32.totalorder %v353_v5, 0  ;;  %vm355_vm2 = vcmp.eq.s32.totalorder %v353_v5, 1  ;;  %vm356_vm3 = vcmp.eq.s32.totalorder %v353_v5, 2  ;;  %v352_v9 = vld [vmem:[%s271_s29 + $0x18] sm:$0xff]  ;;  %s1280_s25 = scalar_lea.hbm %s1412_s3, %s1248_s27  ;;  %s1301_s23 = scalar_lea.hbm %s1413_s4, %s1248_s27 }
  0x44   : > { %v359_v1 = vshrl.u32 %v358_v0, 7  ;;  %v361_v2 = vand.u32 127, %v358_v0  ;;  %vm357_vm5 = vcmp.eq.s32.totalorder %v353_v5, 3  ;;  %s312_s9 = scalar_lea.vmem [#allocation8], %s1214_s5  ;;  %s305_s18 = scalar_lea.vmem [#allocation7], %s1214_s5 }
  0x45   : > { %s554_s11 = sshll.u32 %s312_s9, 4  ;;  %s536_s24 = sshll.u32 %s305_s18, 4  ;;  %s1286_s11 = int_to_ptr.vmem [resolvable:$true] %s554_s11  ;;  %s1294_s24 = int_to_ptr.vmem [resolvable:$true] %s536_s24 }
  0x46   : > { %v362_v3 = vmul.u32 128, %v359_v1  ;;  %s1283_s10 = scalar_lea.vmem [#allocation10], %s1214_s5  ;;  %s1292_s5 = scalar_lea.hbm %s1411_s2, %s1248_s27 }
  0x47   : > { %s572_s12 = sshll.u32 %s1283_s10, 4  ;;  %s1307_s13 = scalar_lea.sflag [#allocation9], %s515_s8  ;;  %s1303_s12 = int_to_ptr.vmem [resolvable:$true] %s572_s12 }
  0x48   : > { %v365_v4 = vadd.s32 %v362_v3, %v361_v2  ;;  %s920_s26 = scalar_lea.vmem %s1286_s11, 512  ;;  %s1067_s6 = smov [#allocation8]  }
  0x49   : > { %p921_p8 = scmp.ne.s32.totalorder %s1286_s11, %s920_s26  ;;  %s924_s14 = sshll.u32 %s1067_s6, 4  ;;  %s925_s14 = int_to_ptr.vmem [resolvable:$false] %s924_s14 }
  0x4a   : > { %vm366_vm1 = vcmp.lt.s32.totalorder %v365_v4, 256  ;;  %p927_p5 = scmp.lt.s32.totalorder %s1286_s11, %s925_s14 }
  0x4b   : > { %vm1230_vm4 = vmand %vm354_vm0, %vm366_vm1  ;;  %v373_v11 = vsel %vm366_vm1, %v349_v6, 0.0  ;;  %v374_v12 = vsel %vm366_vm1, %v350_v7, 0.0  ;;  %v375_v13 = vsel %vm366_vm1, %v351_v8, 0.0  ;;  %v376_v18 = vsel %vm366_vm1, %v352_v9, 0.0  ;;  %p922_p0 = pnand %p921_p8, %p1152_p9 }
  0x4c   : > { %v401_v15 = vsel %vm1230_vm4, 1.0, %v1066_v14  ;;  %vm1240_vm6 = vmand %vm355_vm2, %vm366_vm1  ;;  %v381_v17 = vsel %vm1230_vm4, %v373_v11, 0.0  ;;  %v421_v19 = vmul.f32 %v373_v11, %v373_v11  ;;  %v422_v28 = vmul.f32 %v374_v12, %v374_v12 }
  0x4d   : > { %v402_v20 = vsel %vm1240_vm6, 1.0, %v1066_v14  ;;  %vm1254_vm7 = vmand %vm356_vm3, %vm366_vm1  ;;  %v382_v22 = vsel %vm1240_vm6, %v374_v12, 0.0  ;;  %413 = vst [vmem:[%s312_s9] sm:$0xff] %v401_v15  ;;  %v423_v29 = vmul.f32 %v375_v13, %v375_v13  ;;  %v424_v30 = vmul.f32 %v376_v18, %v376_v18  ;;  %p923_p2 = pneg %p922_p0 }
  0x4e   : > { %v403_v23 = vsel %vm1254_vm7, 1.0, %v1066_v14  ;;  %vm1265_vm8 = vmand %vm357_vm5, %vm366_vm1  ;;  %v383_v25 = vsel %vm1254_vm7, %v375_v13, 0.0  ;;  %393 = vst [vmem:[%s305_s18] sm:$0xff] %v381_v17 }
  0x4f   : > { %v404_v26 = vsel %vm1265_vm8, 1.0, %v1066_v14  ;;  %v384_v27 = vsel %vm1265_vm8, %v376_v18, 0.0  ;;  %414 = vst [vmem:[%s312_s9 + $0x8] sm:$0xff] %v402_v20  ;;  %394 = vst [vmem:[%s305_s18 + $0x8] sm:$0xff] %v382_v22 }
  0x50   : > { %415 = vst [vmem:[%s312_s9 + $0x10] sm:$0xff] %v403_v23  ;;  %395 = vst [vmem:[%s305_s18 + $0x10] sm:$0xff] %v383_v25 }
  0x51   : > { %416 = vst [vmem:[%s312_s9 + $0x18] sm:$0xff] %v404_v26  ;;  %396 = vst [vmem:[%s305_s18 + $0x18] sm:$0xff] %v384_v27  ;;  %s926_s9 = scalar_lea.vmem %s925_s14, 1024 }
  0x52   : > { %433 = vst [vmem:[%s1283_s10] sm:$0xff] %v421_v19  ;;  %p928_p6 = scmp.lt.s32.totalorder %s926_s9, %s920_s26 }
  0x54   : > { %p929_p4 = por %p928_p6, %p927_p5 }
  0x56   : > { %p930_p7 = pnand %p929_p4, %p923_p2 }
  0x58   : > { %933 = shalt.err (!%p930_p7)
}
  0x59   : > { %s934_s21 = scalar_lea.hbm %s1280_s25, 512  ;;  %s938_s18 = scalar_lea.hbm %s1412_s3, 1024 }
  0x5a   : > { %p935_p1 = scmp.ne.s32.totalorder %s1280_s25, %s934_s21  ;;  %p939_p3 = scmp.lt.s32.totalorder %s1280_s25, %s1412_s3 }
  0x5b   : > { %p940_p8 = scmp.lt.s32.totalorder %s938_s18, %s934_s21 }
  0x5c   : > { %p936_p10 = pnand %p935_p1, %p1152_p9 }
  0x5d   : > { %p941_p0 = por %p940_p8, %p939_p3 }
  0x5e   : > { %p937_p13 = pneg %p936_p10 }
  0x60   : > { %p942_p2 = pnand %p941_p0, %p937_p13 }
  0x62   : > { %945 = shalt.err (!%p942_p2)
}
  0x63   : > { %s1068_s0 = smov 128   ;;  %s1069_s26 = smov 8   ;;  %434 = vst [vmem:[%s1283_s10 + $0x8] sm:$0xff] %v422_v28 }
  0x64   : > { %787 = dma.vmem_to_hbm [thread:$0]  (%p1152_p9), %s1286_s11, 512, %s1280_s25, %s1307_s13, %s1068_s0, %s1068_s0, %s1069_s26  }
  0x65   : > { %s511_s6 = scalar_lea.sflag [#allocation4], %s1211_s22  ;;  %s946_s14 = scalar_lea.vmem %s1294_s24, 512 }
  0x66   : > { %p947_p5 = scmp.ne.s32.totalorder %s1294_s24, %s946_s14  ;;  %s1070_s9 = smov [#allocation7]  }
  0x67   : > { %s950_s21 = sshll.u32 %s1070_s9, 4  ;;  %s951_s21 = int_to_ptr.vmem [resolvable:$false] %s950_s21 }
  0x68   : > { %p948_p6 = pnand %p947_p5, %p1152_p9  ;;  %s952_s8 = scalar_lea.vmem %s951_s21, 1024 }
  0x69   : > { %p953_p7 = scmp.lt.s32.totalorder %s1294_s24, %s951_s21  ;;  %p954_p1 = scmp.lt.s32.totalorder %s952_s8, %s946_s14 }
  0x6a   : > { %p949_p4 = pneg %p948_p6 }
  0x6b   : > { %p955_p10 = por %p954_p1, %p953_p7 }
  0x6d   : > { %p956_p13 = pnand %p955_p10, %p949_p4 }
  0x6f   : > { %959 = shalt.err (!%p956_p13)
}
  0x70   : > { %s960_s11 = scalar_lea.hbm %s1292_s5, 512  ;;  %s964_s27 = scalar_lea.hbm %s1411_s2, 1024 }
  0x71   : > { %p961_p3 = scmp.ne.s32.totalorder %s1292_s5, %s960_s11  ;;  %p965_p2 = scmp.lt.s32.totalorder %s1292_s5, %s1411_s2 }
  0x72   : > { %p966_p5 = scmp.lt.s32.totalorder %s964_s27, %s960_s11 }
  0x73   : > { %p962_p8 = pnand %p961_p3, %p1152_p9 }
  0x74   : > { %p967_p6 = por %p966_p5, %p965_p2 }
  0x75   : > { %p963_p0 = pneg %p962_p8 }
  0x77   : > { %p968_p4 = pnand %p967_p6, %p963_p0 }
  0x79   : > { %971 = shalt.err (!%p968_p4)
}
  0x7a   : > { %786 = dma.vmem_to_hbm [thread:$0]  (%p1152_p9), %s1294_s24, 512, %s1292_s5, %s511_s6, %s1068_s0, %s1068_s0, %s1069_s26  }
  0x7b   : > { %435 = vst [vmem:[%s1283_s10 + $0x10] sm:$0xff] %v423_v29  ;;  %436 = vst [vmem:[%s1283_s10 + $0x18] sm:$0xff] %v424_v30  ;;  %s972_s29 = scalar_lea.vmem %s1303_s12, 512  ;;  %s1071_s14 = smov [#allocation10]  }
  0x7c   : > { %p973_p7 = scmp.ne.s32.totalorder %s1303_s12, %s972_s29  ;;  %s976_s9 = sshll.u32 %s1071_s14, 4  ;;  %s977_s9 = int_to_ptr.vmem [resolvable:$false] %s976_s9 }
  0x7d   : > { %s978_s21 = scalar_lea.vmem %s977_s9, 1024  ;;  %p979_p13 = scmp.lt.s32.totalorder %s1303_s12, %s977_s9 }
  0x7e   : > { %p974_p1 = pnand %p973_p7, %p1152_p9  ;;  %p980_p3 = scmp.lt.s32.totalorder %s978_s21, %s972_s29 }
  0x80   : > { %p975_p10 = pneg %p974_p1  ;;  %p981_p8 = por %p980_p3, %p979_p13 }
  0x82   : > { %p982_p0 = pnand %p981_p8, %p975_p10 }
  0x84   : > { %985 = shalt.err (!%p982_p0)
}
  0x85   : > { %s986_s24 = scalar_lea.hbm %s1301_s23, 512  ;;  %s990_s6 = scalar_lea.hbm %s1413_s4, 1024 }
  0x86   : > { %p987_p2 = scmp.ne.s32.totalorder %s1301_s23, %s986_s24  ;;  %p991_p4 = scmp.lt.s32.totalorder %s1301_s23, %s1413_s4 }
  0x87   : > { %p992_p7 = scmp.lt.s32.totalorder %s990_s6, %s986_s24 }
  0x88   : > { %p988_p5 = pnand %p987_p2, %p1152_p9 }
  0x89   : > { %p993_p1 = por %p992_p7, %p991_p4 }
  0x8a   : > { %p989_p6 = pneg %p988_p5 }
  0x8c   : > { %p994_p10 = pnand %p993_p1, %p989_p6 }
  0x8e   : > { %997 = shalt.err (!%p994_p10)
}
  0x8f   : > { %788 = dma.vmem_to_hbm [thread:$0]  (%p1152_p9), %s1303_s12, 512, %s1301_s23, %s1307_s13, %s1068_s0, %s1068_s0, %s1069_s26  }
  0x90 PF: > { %s587_s22 = sand.u32 1, %s1040_s15   ;;  %p800_p13 = pnand %p755_p12, %p1161_p11 }
  0x91   : > { %s588_s25 = scalar_lea.sflag [#allocation4], %s587_s22 }
  0x92   : > { %p801_p3 = pneg %p800_p13 }
  0x94   : > { %1031 = dma.done.wait (%p801_p3), %s588_s25, 512  }
  0x95   : > { %1033 = vsyncadd (%p801_p3), %s588_s25, 4294966784  ;;  %s1434_s28 = sadd.s32 4294967294, %s1060_s20  }
  0x96   : > { %s596_s27 = sand.u32 1, %s1434_s28  }
  0x97   : > { %s597_s18 = scalar_lea.sflag [#allocation9], %s596_s27 }
  0x98   : > { %1035 = dma.done.wait (%p801_p3), %s597_s18, 1024  }
  0x99   : > { %1037 = vsyncadd (%p801_p3), %s597_s18, 4294966272  ;;  %s27_s20 = sadd.s32 1, %s1060_s20   ;;  %s1435_s12 = sld [smem:[#allocation16_spill]] }
  0x9a   : > { %p24_p9 = scmp.ge.s32.totalorder %s27_s20, 4   ;;  %s1436_s30 = sld [smem:[#allocation15_spill]] }
  0x9b   : > { %s1437_s15 = smov %s1044_s16  ;;  %s1438_s16 = smov %s1048_s17 }
  0x9c   : > { %s1440_s18 = smov %s1056_s19  ;;  %26 = sbr.rel (!%p24_p9) target bundleno = 12 (0xc), region = 130 }
  0x9f   : > { %s1439_s17 = smov %s1435_s12 }
  0xa0   : > { %s1441_s19 = smov %s1436_s30 }
  0xa1   :  { %611 = vsyncpa [#allocation3], 1 }
  0xa2   :  { %613 = vsyncpa [#allocation3 + $0x1], 1 }
  0xa3   :  { %614 = vsyncpa [#allocation6], 1 }
  0xa4   :  { %616 = vsyncpa [#allocation6 + $0x1], 1 }
  0xa5   :  { %617 = vsyncpa [#allocation4], 1 }
  0xa6   :  { %619 = vsyncpa [#allocation4 + $0x1], 1 }
  0xa7   :  { %620 = vsyncpa [#allocation9], 1 }
  0xa8   :  { %622 = vsyncpa [#allocation9 + $0x1], 1 }

</bundles_post_ra>
